<compile_context>
chip_gen: v7x
topology: tpu7x:2x2x1
jax: 0.10.0
libtpu: 0.0.40
codegen_flags: <defaults>
</compile_context>

<pallas_src>
import functools

import jax
import jax.numpy as jnp
from jax import lax
from jax.experimental import pallas as pl
from jax.experimental.pallas import tpu as pltpu


_EPS_SQ = 1e-24                    # (1e-12)**2 — matches F.normalize eps clamp
_VMEM_LIMIT = 48 * 1024 * 1024     # scoped VMEM ceiling requested from Mosaic
_VMEM_BUDGET = 40 * 1024 * 1024    # conservative planning budget for tiling


def _normalize_and_scale(x, extra_scale):
    """Row-wise L2 normalize (f32 math) times extra_scale, divide-free."""
    sq = jnp.sum(x * x, axis=1, keepdims=True)
    inv = lax.rsqrt(jnp.maximum(sq, jnp.float32(_EPS_SQ)))  # == 1/max(||x||, eps)
    return x * (inv * jnp.float32(extra_scale))


def _normalized_query_block(xq_ref, inv_temperature, matmul_dtype):
    xq = xq_ref[...].astype(jnp.float32)                     # (TQ, D)
    # Fold 1/temperature into the query scale so no divide / extra mul ever
    # touches the (TQ, N) similarity tile.
    return _normalize_and_scale(xq, inv_temperature).astype(matmul_dtype)


def _log_softmax_parts(sim):
    """Return (shifted, lse) so that -log_softmax = lse - shifted."""
    row_max = jnp.max(sim, axis=1, keepdims=True)
    shifted = sim - row_max
    lse = jnp.log(jnp.sum(jnp.exp(shifted), axis=1, keepdims=True))
    return shifted, lse


def _loss_kernel_diag(xq_ref, xk_ref, out_ref, xkn_ref, *,
                      inv_temperature, matmul_dtype):
    """mask_pos=None path: identity mask handled implicitly (no N x N stream)."""
    i = pl.program_id(0)

    @pl.when(i == 0)
    def _():
        out_ref[...] = jnp.zeros_like(out_ref)
        # Normalize + cast keys once; reused by every query block.
        xk = xk_ref[...].astype(jnp.float32)
        xkn_ref[...] = _normalize_and_scale(xk, 1.0).astype(matmul_dtype)

    xq_n = _normalized_query_block(xq_ref, inv_temperature, matmul_dtype)
    sim = lax.dot_general(xq_n, xkn_ref[...],
                          dimension_numbers=(((1,), (1,)), ((), ())),
                          preferred_element_type=jnp.float32)     # (TQ, N)
    shifted, lse = _log_softmax_parts(sim)

    # Row r of this block is global row i*TQ + r; its positive column is that
    # same index.  Identity rows sum to 1 so no reciprocal is needed.
    tq, n = sim.shape
    row_ids = lax.broadcasted_iota(jnp.int32, (tq, n), 0) + i * tq
    col_ids = lax.broadcasted_iota(jnp.int32, (tq, n), 1)
    diag = jnp.sum(jnp.where(row_ids == col_ids, shifted, 0.0),
                   axis=1, keepdims=True)                          # (TQ, 1)
    out_ref[...] = out_ref[...] + jnp.sum(lse - diag)

    @pl.when(i == pl.num_programs(0) - 1)
    def _():
        out_ref[...] = out_ref[...] * jnp.float32(1.0 / (n * n))


def _loss_kernel_masked(xq_ref, xk_ref, mask_ref, out_ref, xkn_ref, *,
                        inv_temperature, matmul_dtype):
    """User-supplied positive mask path."""
    i = pl.program_id(0)

    @pl.when(i == 0)
    def _():
        out_ref[...] = jnp.zeros_like(out_ref)
        xk = xk_ref[...].astype(jnp.float32)
        xkn_ref[...] = _normalize_and_scale(xk, 1.0).astype(matmul_dtype)

    xq_n = _normalized_query_block(xq_ref, inv_temperature, matmul_dtype)
    sim = lax.dot_general(xq_n, xkn_ref[...],
                          dimension_numbers=(((1,), (1,)), ((), ())),
                          preferred_element_type=jnp.float32)     # (TQ, N)
    shifted, lse = _log_softmax_parts(sim)
    nls = lse - shifted                                            # (TQ, N)

    # Mask arrives in whatever (narrow) dtype the caller used; cast is cheap
    # VPU filler under the MXU/EUP work.
    mask = mask_ref[...].astype(jnp.float32)                       # (TQ, N)

    # nll = nls * mask / mask.sum(dim=1): reduce first, then one reciprocal and
    # one (TQ,1) multiply per row -- no extra (TQ,N)-sized multiply.
    row_sum = jnp.sum(mask, axis=1, keepdims=True)                 # (TQ, 1)
    masked_row = jnp.sum(nls * mask, axis=1, keepdims=True)        # (TQ, 1)
    inv_row = pl.reciprocal(row_sum, approx=False)
    out_ref[...] = out_ref[...] + jnp.sum(masked_row * inv_row)

    n_total = xk_ref.shape[0]

    @pl.when(i == pl.num_programs(0) - 1)
    def _():
        out_ref[...] = out_ref[...] * jnp.float32(1.0 / (n_total * n_total))


def _choose_row_tile(n, d, mask_bytes, vmem_budget=_VMEM_BUDGET):
    """Largest query-row tile (divisor of N) whose working set fits VMEM."""
    def footprint(tq):
        work = tq * n * (3 * 4 + 3 * mask_bytes)    # sim/exp/nls f32 + mask bufs
        keys = n * d * (2 * 4 + 2)                  # f32 key buffers + bf16 scratch
        qrys = 2 * tq * d * 4                       # double-buffered query tiles
        return work + keys + qrys

    cands = [n] + [t for t in (512, 256, 128, 64, 32, 16, 8)
                   if t < n and n % t == 0]
    for tq in cands:
        if footprint(tq) <= vmem_budget:
            return tq
    return cands[-1]


def contrastive_loss(x_q, x_k, mask_pos=None, temperature=1.0,
                     matmul_dtype=jnp.bfloat16, row_block=None):
    """JAX/Pallas equivalent of ContrastiveLoss.forward."""
    N, D = x_q.shape
    assert x_k.shape == (N, D)
    inv_temperature = 1.0 / float(temperature)

    if mask_pos is not None and mask_pos.dtype == jnp.bool_:
        mask_pos = mask_pos.astype(jnp.int8)   # narrow HBM stream; cast in-kernel
    mask_bytes = 0 if mask_pos is None else jnp.dtype(mask_pos.dtype).itemsize

    tq = row_block if row_block is not None else _choose_row_tile(N, D, mask_bytes)
    assert tq == N or N % tq == 0, "row tile must divide N"
    grid = (N // tq,)

    xq_spec = pl.BlockSpec((tq, D), lambda i: (i, 0))
    xk_spec = pl.BlockSpec((N, D), lambda i: (0, 0))      # keys resident
    out_spec = pl.BlockSpec((1, 128), lambda i: (0, 0))   # lane-dense accumulator
    out_shape = jax.ShapeDtypeStruct((1, 128), jnp.float32)
    scratch = [pltpu.VMEM((N, D), matmul_dtype)]          # normalized-key cache
    compiler_params = pltpu.CompilerParams(
        # Grid axis is a reduction into the resident output block.
        dimension_semantics=("arbitrary",),
        vmem_limit_bytes=_VMEM_LIMIT,
    )

    if mask_pos is None:
        kernel = functools.partial(_loss_kernel_diag,
                                   inv_temperature=inv_temperature,
                                   matmul_dtype=matmul_dtype)
        out = pl.pallas_call(
            kernel,
            out_shape=out_shape,
            grid=grid,
            in_specs=[xq_spec, xk_spec],
            out_specs=out_spec,
            scratch_shapes=scratch,
            compiler_params=compiler_params,
        )(x_q, x_k)
    else:
        kernel = functools.partial(_loss_kernel_masked,
                                   inv_temperature=inv_temperature,
                                   matmul_dtype=matmul_dtype)
        out = pl.pallas_call(
            kernel,
            out_shape=out_shape,
            grid=grid,
            in_specs=[xq_spec, xk_spec,
                      pl.BlockSpec((tq, N), lambda i: (i, 0))],
            out_specs=out_spec,
            scratch_shapes=scratch,
            compiler_params=compiler_params,
        )(x_q, x_k, mask_pos)

    return out[0, 0]


# ----------------------------- references ----------------------------------


def _reference_loss(x_q, x_k, mask_pos=None, temperature=1.0):
    """Pure-JAX f32 reference mirroring the PyTorch module."""
    eps = 1e-12
    xq = x_q / jnp.maximum(jnp.linalg.norm(x_q, axis=1, keepdims=True), eps)
    xk = x_k / jnp.maximum(jnp.linalg.norm(x_k, axis=1, keepdims=True), eps)
    N = xq.shape[0]
    if mask_pos is None:
        mask_pos = jnp.eye(N, dtype=jnp.float32)
    mask_pos = mask_pos.astype(jnp.float32)
    sim = jnp.matmul(xq, xk.T) / temperature
    nls = -jax.nn.log_softmax(sim, axis=1)
    nll = nls * mask_pos / jnp.sum(mask_pos, axis=1, keepdims=True)
    return jnp.mean(nll)


def _reference_loss_mirrored(x_q, x_k, mask_pos=None, temperature=1.0,
                             matmul_dtype=jnp.bfloat16):
    """Reference mirroring the kernel's bf16-operand matmul (tight check)."""
    inv_t = jnp.float32(1.0 / temperature)
    sq = lax.rsqrt(jnp.maximum(jnp.sum(x_q * x_q, axis=1, keepdims=True), _EPS_SQ)) * inv_t
    sk = lax.rsqrt(jnp.maximum(jnp.sum(x_k * x_k, axis=1, keepdims=True), _EPS_SQ))
    xq_n = (x_q * sq).astype(matmul_dtype)
    xk_n = (x_k * sk).astype(matmul_dtype)
    sim = lax.dot_general(xq_n, xk_n, (((1,), (1,)), ((), ())),
                          preferred_element_type=jnp.float32)
    nls = -jax.nn.log_softmax(sim, axis=1)
    N = x_q.shape[0]
    if mask_pos is None:
        mask_pos = jnp.eye(N, dtype=jnp.float32)
    mask_pos = mask_pos.astype(jnp.float32)
    nll = nls * mask_pos / jnp.sum(mask_pos, axis=1, keepdims=True)
    return jnp.mean(nll)


if __name__ == "__main__":
    key = jax.random.PRNGKey(0)
    kq, kk, km, kq2, kk2, km2 = jax.random.split(key, 6)

    # ---- case 1: N=8, D=32, default (identity) mask, single block ----
    N, D = 8, 32
    x_q = jax.random.normal(kq, (N, D), dtype=jnp.float32)
    x_k = jax.random.normal(kk, (N, D), dtype=jnp.float32)

    loss = jax.block_until_ready(contrastive_loss(x_q, x_k, temperature=1.0))
    ref_exact = _reference_loss_mirrored(x_q, x_k, temperature=1.0)
    ref_f32 = _reference_loss(x_q, x_k, temperature=1.0)
    assert jnp.allclose(loss, ref_exact, atol=1e-3, rtol=1e-3), (loss, ref_exact)
    assert jnp.allclose(loss, ref_f32, atol=2e-2, rtol=2e-2), (loss, ref_f32)

    # ---- case 2: user-supplied positive mask in a narrow dtype (bf16) ----
    mask_f32 = (jax.random.uniform(km, (N, N)) < 0.25).astype(jnp.float32)
    mask_f32 = jnp.maximum(mask_f32, jnp.eye(N, dtype=jnp.float32))  # no empty rows
    mask_bf16 = mask_f32.astype(jnp.bfloat16)

    loss_m = jax.block_until_ready(
        contrastive_loss(x_q, x_k, mask_pos=mask_bf16, temperature=0.5))
    ref_m_exact = _reference_loss_mirrored(x_q, x_k, mask_pos=mask_f32, temperature=0.5)
    ref_m_f32 = _reference_loss(x_q, x_k, mask_pos=mask_f32, temperature=0.5)
    assert jnp.allclose(loss_m, ref_m_exact, atol=1e-3, rtol=1e-3), (loss_m, ref_m_exact)
    assert jnp.allclose(loss_m, ref_m_f32, atol=2e-2, rtol=2e-2), (loss_m, ref_m_f32)

    # ---- case 3: multi-block grid (N=16, row tile 8) exercises the scratch
    #      key cache, accumulator init/finalize and diagonal offset logic ----
    N2, D2 = 16, 32
    x_q2 = jax.random.normal(kq2, (N2, D2), dtype=jnp.float32)
    x_k2 = jax.random.normal(kk2, (N2, D2), dtype=jnp.float32)

    loss2 = jax.block_until_ready(
        contrastive_loss(x_q2, x_k2, temperature=0.7, row_block=8))
    ref2 = _reference_loss_mirrored(x_q2, x_k2, temperature=0.7)
    assert jnp.allclose(loss2, ref2, atol=1e-3, rtol=1e-3), (loss2, ref2)

    mask2 = (jax.random.uniform(km2, (N2, N2)) < 0.3).astype(jnp.float32)
    mask2 = jnp.maximum(mask2, jnp.eye(N2, dtype=jnp.float32))
    loss2m = jax.block_until_ready(
        contrastive_loss(x_q2, x_k2, mask_pos=mask2.astype(jnp.bool_),
                         temperature=0.7, row_block=8))
    ref2m = _reference_loss_mirrored(x_q2, x_k2, mask_pos=mask2, temperature=0.7)
    assert jnp.allclose(loss2m, ref2m, atol=1e-3, rtol=1e-3), (loss2m, ref2m)

    print("KERNEL_OK")
</pallas_src>

<mosaic_0001>
module attributes {stable_mosaic.version = 11 : i64} {
  func.func @_loss_kernel_diag(%arg0: i32, %arg1: memref<8x32xf32, #tpu.memory_space<vmem>>, %arg2: memref<8x32xf32, #tpu.memory_space<vmem>>, %arg3: memref<1x128xf32, #tpu.memory_space<vmem>>, %arg4: memref<8x32xbf16, #tpu.memory_space<vmem>>) attributes {dimension_semantics = [#tpu.dimension_semantics<arbitrary>], iteration_bounds = array<i64: 1>, scalar_prefetch = 0 : i64, scratch_operands = 1 : i64, tpu.core_type = #tpu.core_type<tc>, window_params = [{transform_indices = @transform_0, window_bounds = array<i64: 8, 32>}, {pipeline_mode = #tpu.pipeline_mode<synchronous>, transform_indices = @transform_1, window_bounds = array<i64: 8, 32>}, {pipeline_mode = #tpu.pipeline_mode<synchronous>, transform_indices = @transform_2, window_bounds = array<i64: 1, 128>}]} {
    %c0_i32 = arith.constant 0 : i32
    %0 = arith.cmpi eq, %arg0, %c0_i32 : i32
    %1 = arith.extui %0 : i1 to i32
    %c0_i32_0 = arith.constant 0 : i32
    %2 = arith.cmpi ne, %1, %c0_i32_0 : i32
    scf.if %2 {
      %cst_18 = arith.constant 0.000000e+00 : f32
      %47 = vector.broadcast %cst_18 : f32 to vector<1x128xf32>
      %c0_19 = arith.constant 0 : index
      %c0_20 = arith.constant 0 : index
      %48 = vector.load %arg3[%c0_19, %c0_20] : memref<1x128xf32, #tpu.memory_space<vmem>>, vector<1x128xf32>
      tpu.vector_store %arg3[%c0_19, %c0_20], %47 {strides = array<i32>} : memref<1x128xf32, #tpu.memory_space<vmem>>, vector<1x128xf32>,
      %c0_21 = arith.constant 0 : index
      %c0_22 = arith.constant 0 : index
      %49 = vector.load %arg2[%c0_21, %c0_22] : memref<8x32xf32, #tpu.memory_space<vmem>>, vector<8x32xf32>
      %50 = arith.mulf %49, %49 : vector<8x32xf32>
      %cst_23 = arith.constant dense<0.000000e+00> : vector<8xf32>
      %51 = vector.multi_reduction <add>, %50, %cst_23 [1] : vector<8x32xf32> to vector<8xf32>
      %52 = vector.shape_cast %51 : vector<8xf32> to vector<8x1xf32>
      %cst_24 = arith.constant 1.000000e-24 : f32
      %53 = vector.broadcast %cst_24 : f32 to vector<8x1xf32>
      %54 = arith.maximumf %52, %53 : vector<8x1xf32>
      %55 = math.rsqrt %54 : vector<8x1xf32>
      %cst_25 = arith.constant 1.000000e+00 : f32
      %56 = vector.broadcast %cst_25 : f32 to vector<8x1xf32>
      %57 = arith.mulf %55, %56 : vector<8x1xf32>
      %58 = vector.broadcast %57 : vector<8x1xf32> to vector<8x32xf32>
      %59 = arith.mulf %49, %58 : vector<8x32xf32>
      %60 = arith.truncf %59 : vector<8x32xf32> to vector<8x32xbf16>
      %c0_26 = arith.constant 0 : index
      %c0_27 = arith.constant 0 : index
      %61 = vector.load %arg4[%c0_26, %c0_27] : memref<8x32xbf16, #tpu.memory_space<vmem>>, vector<8x32xbf16>
      tpu.vector_store %arg4[%c0_26, %c0_27], %60 {strides = array<i32>} : memref<8x32xbf16, #tpu.memory_space<vmem>>, vector<8x32xbf16>,
    } else {
    }
    %c0 = arith.constant 0 : index
    %c0_1 = arith.constant 0 : index
    %3 = vector.load %arg1[%c0, %c0_1] : memref<8x32xf32, #tpu.memory_space<vmem>>, vector<8x32xf32>
    %4 = arith.mulf %3, %3 : vector<8x32xf32>
    %cst = arith.constant dense<0.000000e+00> : vector<8xf32>
    %5 = vector.multi_reduction <add>, %4, %cst [1] : vector<8x32xf32> to vector<8xf32>
    %6 = vector.shape_cast %5 : vector<8xf32> to vector<8x1xf32>
    %cst_2 = arith.constant 1.000000e-24 : f32
    %7 = vector.broadcast %cst_2 : f32 to vector<8x1xf32>
    %8 = arith.maximumf %6, %7 : vector<8x1xf32>
    %9 = math.rsqrt %8 : vector<8x1xf32>
    %cst_3 = arith.constant 1.000000e+00 : f32
    %10 = vector.broadcast %cst_3 : f32 to vector<8x1xf32>
    %11 = arith.mulf %9, %10 : vector<8x1xf32>
    %12 = vector.broadcast %11 : vector<8x1xf32> to vector<8x32xf32>
    %13 = arith.mulf %3, %12 : vector<8x32xf32>
    %14 = arith.truncf %13 : vector<8x32xf32> to vector<8x32xbf16>
    %c0_4 = arith.constant 0 : index
    %c0_5 = arith.constant 0 : index
    %15 = vector.load %arg4[%c0_4, %c0_5] : memref<8x32xbf16, #tpu.memory_space<vmem>>, vector<8x32xbf16>
    %cst_6 = arith.constant dense<0.000000e+00> : vector<8x8xf32>
    %16 = tpu.matmul %14, %15, %cst_6 {dimension_numbers = #tpu.dot_dimension_numbers<[1], [1], [0], [0], [0, 0, 1, 0], [], []>} : vector<8x32xbf16>, vector<8x32xbf16>, vector<8x8xf32> -> vector<8x8xf32>
    %cst_7 = arith.constant dense<0xFF800000> : vector<8xf32>
    %17 = vector.multi_reduction <maximumf>, %16, %cst_7 [1] : vector<8x8xf32> to vector<8xf32>
    %18 = vector.shape_cast %17 : vector<8xf32> to vector<8x1xf32>
    %19 = vector.broadcast %18 : vector<8x1xf32> to vector<8x8xf32>
    %20 = arith.subf %16, %19 : vector<8x8xf32>
    %21 = math.exp %20 : vector<8x8xf32>
    %cst_8 = arith.constant dense<0.000000e+00> : vector<8xf32>
    %22 = vector.multi_reduction <add>, %21, %cst_8 [1] : vector<8x8xf32> to vector<8xf32>
    %23 = vector.shape_cast %22 : vector<8xf32> to vector<8x1xf32>
    %24 = math.log %23 : vector<8x1xf32>
    %25 = tpu.iota {dimensions = array<i32: 0>} : vector<8x8xi32>
    %c8_i32 = arith.constant 8 : i32
    %26 = arith.muli %arg0, %c8_i32 : i32
    %27 = vector.broadcast %26 : i32 to vector<8x8xi32>
    %28 = arith.addi %25, %27 : vector<8x8xi32>
    %29 = tpu.iota {dimensions = array<i32: 1>} : vector<8x8xi32>
    %30 = arith.cmpi eq, %28, %29 : vector<8x8xi32>
    %cst_9 = arith.constant 0.000000e+00 : f32
    %31 = vector.broadcast %cst_9 : f32 to vector<8x8xf32>
    %32 = arith.select %30, %20, %31 : vector<8x8xi1>, vector<8x8xf32>
    %cst_10 = arith.constant dense<0.000000e+00> : vector<8xf32>
    %33 = vector.multi_reduction <add>, %32, %cst_10 [1] : vector<8x8xf32> to vector<8xf32>
    %34 = vector.shape_cast %33 : vector<8xf32> to vector<8x1xf32>
    %c0_11 = arith.constant 0 : index
    %c0_12 = arith.constant 0 : index
    %35 = vector.load %arg3[%c0_11, %c0_12] : memref<1x128xf32, #tpu.memory_space<vmem>>, vector<1x128xf32>
    %36 = arith.subf %24, %34 : vector<8x1xf32>
    %37 = vector.shape_cast %36 : vector<8x1xf32> to vector<1x8x1xf32>
    %cst_13 = arith.constant dense<0.000000e+00> : vector<1xf32>
    %38 = vector.multi_reduction <add>, %37, %cst_13 [1, 2] : vector<1x8x1xf32> to vector<1xf32>
    %39 = vector.shape_cast %38 : vector<1xf32> to vector<1x1x1xf32>
    %40 = vector.extract %39[0, 0, 0] : f32 from vector<1x1x1xf32>
    %41 = vector.broadcast %40 : f32 to vector<1x128xf32>
    %42 = arith.addf %35, %41 : vector<1x128xf32>
    %c0_14 = arith.constant 0 : index
    %c0_15 = arith.constant 0 : index
    %43 = vector.load %arg3[%c0_14, %c0_15] : memref<1x128xf32, #tpu.memory_space<vmem>>, vector<1x128xf32>
    tpu.vector_store %arg3[%c0_14, %c0_15], %42 {strides = array<i32>} : memref<1x128xf32, #tpu.memory_space<vmem>>, vector<1x128xf32>,
    %c0_i32_16 = arith.constant 0 : i32
    %44 = arith.cmpi eq, %arg0, %c0_i32_16 : i32
    %45 = arith.extui %44 : i1 to i32
    %c0_i32_17 = arith.constant 0 : i32
    %46 = arith.cmpi ne, %45, %c0_i32_17 : i32
    scf.if %46 {
      %c0_18 = arith.constant 0 : index
      %c0_19 = arith.constant 0 : index
      %47 = vector.load %arg3[%c0_18, %c0_19] : memref<1x128xf32, #tpu.memory_space<vmem>>, vector<1x128xf32>
      %cst_20 = arith.constant 1.562500e-02 : f32
      %48 = vector.broadcast %cst_20 : f32 to vector<1x128xf32>
      %49 = arith.mulf %47, %48 : vector<1x128xf32>
      %c0_21 = arith.constant 0 : index
      %c0_22 = arith.constant 0 : index
      %50 = vector.load %arg3[%c0_21, %c0_22] : memref<1x128xf32, #tpu.memory_space<vmem>>, vector<1x128xf32>
      tpu.vector_store %arg3[%c0_21, %c0_22], %49 {strides = array<i32>} : memref<1x128xf32, #tpu.memory_space<vmem>>, vector<1x128xf32>,
    } else {
    }
    return
  }
  func.func @transform_0(%arg0: i32) -> (i32, i32) {
    %c0_i32 = arith.constant 0 : i32
    %c0_i32_0 = arith.constant 0 : i32
    return %arg0, %c0_i32 : i32, i32
  }
  func.func @transform_1(%arg0: i32) -> (i32, i32) {
    %c0_i32 = arith.constant 0 : i32
    %c0_i32_0 = arith.constant 0 : i32
    %c0_i32_1 = arith.constant 0 : i32
    return %c0_i32, %c0_i32_0 : i32, i32
  }
  func.func @transform_2(%arg0: i32) -> (i32, i32) {
    %c0_i32 = arith.constant 0 : i32
    %c0_i32_0 = arith.constant 0 : i32
    %c0_i32_1 = arith.constant 0 : i32
    return %c0_i32, %c0_i32_0 : i32, i32
  }
}

</mosaic_0001>

<bundles_post_ra>
// kernel: tpu_custom_call.1
= control target key start
LH: loop header
LB: loop body
LE: loop exit
PB: predicated region body
PF: predicated region fallthrough
CT: control target
= control target key end

     0   :  { %7 = vsyncpa [#allocation4], 0  ;;  %s332_s0 = inlined_call_operand.hbm [shape: f32[8,32], index: 0, kind: input, shape index: {}]   ;;  %s333_s1 = inlined_call_operand.hbm [shape: f32[8,32], index: 1, kind: input, shape index: {}]   ;;  %s334_s2 = inlined_call_operand.hbm [shape: f32[1,128], index: 2, kind: output, shape index: {}]  }
   0x1   :  { %8 = vsyncpa [#allocation7], 0 }
   0x2   :  { %9 = vsyncpa [#allocation5], 0  ;;  %s269_s9 = smov [#allocation3]   ;;  %s270_s11 = smov [#allocation6]  }
   0x3   :  { %s16_s10 = sshll.u32 %s269_s9, 4  ;;  %s26_s12 = sshll.u32 %s270_s11, 4  ;;  %s17_s10 = int_to_ptr.vmem [resolvable:$true] %s16_s10  ;;  %s27_s12 = int_to_ptr.vmem [resolvable:$true] %s26_s12 }
   0x4   :  { %s197_s15 = scalar_lea.hbm %s332_s0, 128 }
   0x5   :  { %p198_p0 = scmp.ne.s32.totalorder %s332_s0, %s197_s15  ;;  %p201_p1 = scmp.lt.u32.totalorder %s197_s15, %s332_s0 }
   0x7   :  { %p203_p2 = pnand %p201_p1, %p198_p0 }
   0x9   :  { %206 = shalt.err (!%p203_p2)
}
   0xa   :  { %s207_s20 = scalar_lea.vmem %s17_s10, 128  ;;  %p212_p4 = scmp.lt.s32.totalorder %s17_s10, %s17_s10 }
   0xb   :  { %p208_p3 = scmp.ne.s32.totalorder %s17_s10, %s207_s20  ;;  %p213_p5 = scmp.lt.s32.totalorder %s207_s20, %s207_s20 }
   0xd   :  { %p214_p6 = por %p213_p5, %p212_p4 }
   0xf   :  { %p215_p7 = pnand %p214_p6, %p208_p3 }
  0x11   :  { %218 = shalt.err (!%p215_p7)
}
  0x12   :  { %19 = dma.hbm_to_vmem [thread:$0]  %s332_s0, 128, %s17_s10, [#allocation4]  }
  0x13   :  { %s219_s25 = scalar_lea.hbm %s333_s1, 128 }
  0x14   :  { %p220_p8 = scmp.ne.s32.totalorder %s333_s1, %s219_s25  ;;  %p223_p9 = scmp.lt.u32.totalorder %s219_s25, %s333_s1 }
  0x16   :  { %p225_p10 = pnand %p223_p9, %p220_p8 }
  0x18   :  { %228 = shalt.err (!%p225_p10)
}
  0x19   :  { %s229_s30 = scalar_lea.vmem %s27_s12, 128  ;;  %p234_p12 = scmp.lt.s32.totalorder %s27_s12, %s27_s12 }
  0x1a   :  { %p230_p11 = scmp.ne.s32.totalorder %s27_s12, %s229_s30  ;;  %p235_p13 = scmp.lt.s32.totalorder %s229_s30, %s229_s30 }
  0x1c   :  { %p236_p0 = por %p235_p13, %p234_p12 }
  0x1e   :  { %p237_p1 = pnand %p236_p0, %p230_p11 }
  0x20   :  { %240 = shalt.err (!%p237_p1)
}
  0x21   :  { %29 = dma.hbm_to_vmem [thread:$0]  %s333_s1, 128, %s27_s12, [#allocation7]  }
  0x22   :  { %263 = dma.done.wait [#allocation4], 128  }
  0x23   :  { %264 = vsyncadd [#allocation4], 4294967168 }
  0x24   :  { %265 = dma.done.wait [#allocation7], 128  }
  0x25   :  { %266 = vsyncadd [#allocation7], 4294967168  ;;  %v42_v0 = vld [vmem:[#allocation6] sm:$0xff]  ;;  %vm44_vm0 = vcmask 261120   ;;  %v54_v1 = vld [vmem:[#allocation3] sm:$0xff]  ;;  %v271_v6 = vmov 0.0   ;;  %v123_v24 = vlaneseq }
  0x26   :  { %v43_v2 = vmul.f32 %v42_v0, %v42_v0  ;;  %v55_v3 = vmul.f32 %v54_v1, %v54_v1  ;;  %41 = vst [vmem:[#allocation8] sm:$0x1] %v271_v6  ;;  %176 = vmatprep.subr.bf16.mxu0 %v271_v6  ;;  %vm272_vm1 = vmmov 0   ;;  %vm52_vm2 = vcmask 257024   ;;  %s273_s4 = smov [#allocation8]  }
  0x27   :  { %178 = vmatprep.mubr.msk.bf16.mxu0 %vm272_vm1, %v271_v6  ;;  %vm111_vm3 = vcmask 64512   ;;  %v124_v25 = vshrl.u32 %v123_v24, 7  ;;  %v129_v26 = vand.u32 127, %v123_v24  ;;  %vm137_vm5 = vcmask 7168   ;;  %s163_s5 = sshll.u32 %s273_s4, 4  ;;  %s164_s5 = int_to_ptr.vmem [resolvable:$true] %s163_s5 }
  0x28   :  { %v45_v4 = vsel %vm44_vm0, %v43_v2, 0.0  ;;  %v57_v5 = vsel %vm44_vm0, %v55_v3, 0.0  ;;  %s241_s6 = scalar_lea.vmem %s164_s5, 16  ;;  %s245_s7 = scalar_lea.vmem %s164_s5, 32 }
  0x29   :  { %46 = vadd.xlane.f32.xlu0 %v45_v4  ;;  %vm130_vm4 = vcmp.eq.s32.totalorder %v124_v25, %v129_v26  ;;  %p242_p2 = scmp.ne.s32.totalorder %s164_s5, %s241_s6  ;;  %p246_p3 = scmp.lt.s32.totalorder %s164_s5, %s164_s5 }
  0x2a   :  { %p247_p4 = scmp.lt.s32.totalorder %s245_s7, %s241_s6 }
  0x2c   :  { %p248_p5 = por %p247_p4, %p246_p3 }
  0x2d   :  { %58 = vadd.xlane.f32.xlu0 %v57_v5  ;;  %v135_v47 = vld [vmem:[#allocation8] sm:$0x1] }
  0x2e   :  { %p249_p6 = pnand %p248_p5, %p242_p2 }
  0xb6   :  { %v47_v7 = vpop.xlane.xlu0 %46 }
  0xb7   :  { %v48_v8 = vmax.f32 %v47_v7, 1e-24 }
  0xb9   :  { %189 = vrsqrt.f32 %v48_v8 }
  0xba   :  { %v59_v9 = vpop.xlane.xlu0 %58 }
  0xbb   :  { %v60_v10 = vmax.f32 %v59_v9, 1e-24 }
  0xbd   :  { %191 = vrsqrt.f32 %v60_v10 }
  0xc3   :  { %v190_v11 = vpop.eup %189 }
  0xc4   :  { %v50_v12 = vmul.f32 %v190_v11, %v42_v0 }
  0xc6   :  { %v51_v13 = vpack.c.bf16 %v50_v12, %v50_v12 }
  0xc7   :  { %v192_v14 = vpop.eup %191 }
  0xc8   :  { %53 = vst.msk [vmem:[#allocation2] sm:$0xf] %vm52_vm2, %v51_v13  ;;  %v62_v17 = vmul.f32 %v192_v14, %v54_v1 }
  0xca   :  { %v63_v18 = vpack.c.bf16 %v62_v17, %v62_v17 }
  0xcf   :  { %v64_v15 = vld [vmem:[#allocation2] sm:$0xf] }
  0xd0   :  { %v69_v16 = vsel %vm44_vm0, %v64_v15, 0 }
  0xd1   :  { %177 = vmatpush3.bf16.xpose.msra.mxu0 %v69_v16 }
  0xd8   :  { %179 = vmatmul.mubr.msk.bf16.vlgmr.msra.gmra.mrb[0].mxu0 %vm44_vm0, %v63_v18 }
 0x1ab   :  { %v105_v19 = vpop.f32.mrb[0].mxu0 }
 0x1ac   :  { %v180_v20 = vpop.f32.mrb[1].mxu0  ;;  %v112_v21 = vsel %vm111_vm3, %v105_v19, -inf }
 0x1ad   :  { %113 = vmax.xlane.f32.xlu1 %v112_v21  ;;  %v108_v22 = vpop.f32.mrb[2].mxu0 }
 0x1ae   :  { %v181_v23 = vpop.f32.mrb[3].mxu0 }
 0x23a   :  { %v114_v27 = vpop.xlane.xlu1 %113 }
 0x23b   :  { %v115_v28 = vsub.f32 %v105_v19, %v114_v27 }
 0x23d   :  { %v116_v29 = vmul.f32 1.442695, %v115_v28  ;;  %v131_v30 = vsel %vm130_vm4, %v115_v28, 0.0 }
 0x23e   :  { %v132_v31 = vsel %vm111_vm3, %v131_v30, 0.0 }
 0x23f   :  { %193 = vpow2.f32 %v116_v29  ;;  %133 = vadd.xlane.f32.xlu0 %v132_v31 }
 0x249   :  { %v194_v32 = vpop.eup %193 }
 0x24a   :  { %v118_v33 = vsel %vm111_vm3, %v194_v32, 0.0 }
 0x24b   :  { %119 = vadd.xlane.f32.xlu1 %v118_v33 }
 0x2cc   :  { %v134_v37 = vpop.xlane.xlu0 %133 }
 0x2d8   :  { %v120_v34 = vpop.xlane.xlu1 %119 }
 0x2d9   :  { %195 = vlog2.f32 %v120_v34 }
 0x2e3   :  { %v196_v35 = vpop.eup %195 }
 0x2e4   :  { %v122_v36 = vmul.f32 0.6931472, %v196_v35 }
 0x2e6   :  { %v136_v38 = vsub.f32 %v122_v36, %v134_v37 }
 0x2e8   :  { %v138_v39 = vsel %vm137_vm5, %v136_v38, 0.0 }
 0x2e9   :  { %139 = vadd.xlane.f32.xlu1 %v138_v39 }
 0x376   :  { %v140_v40 = vpop.xlane.xlu1 %139 }
 0x377   :  { %v141_v41 = vrot.slane %v140_v40, 4 }
 0x379   :  { %v142_v42 = vadd.f32 %v141_v41, %v140_v40 }
 0x37b   :  { %v143_v43 = vrot.slane %v142_v42, 2 }
 0x37d   :  { %v144_v44 = vadd.f32 %v143_v43, %v142_v42 }
 0x37f   :  { %v145_v45 = vrot.slane %v144_v44, 1 }
 0x381   :  { %v146_v46 = vadd.f32 %v145_v45, %v144_v44 }
 0x383   :  { %182 = vpush %v146_v46 }
 0x3b4   :  { %s183_s1 = spop %182 }
 0x3b5   :  { %v148_v48 = vstv %s183_s1 }
 0x3b6   :  { %v149_v49 = vadd.f32 %v148_v48, %v135_v47 }
 0x3b8   :  { %150 = vst [vmem:[#allocation8] sm:$0x1] %v149_v49 }
 0x3bf   :  { %v154_v50 = vld [vmem:[#allocation8] sm:$0x1] }
 0x3c0   :  { %v155_v51 = vmul.f32 0.015625, %v154_v50 }
 0x3c2   :  { %156 = vst [vmem:[#allocation8] sm:$0x1] %v155_v51 }
 0x3c3   :  { %252 = shalt.err (!%p249_p6)
}
 0x3c4   :  { %s253_s10 = scalar_lea.hbm %s334_s2, 16 }
 0x3c5   :  { %p254_p7 = scmp.ne.s32.totalorder %s334_s2, %s253_s10  ;;  %p257_p8 = scmp.lt.u32.totalorder %s253_s10, %s334_s2 }
 0x3c7   :  { %p259_p9 = pnand %p257_p8, %p254_p7 }
 0x3c9   :  { %262 = shalt.err (!%p259_p9)
}
 0x3ca   :  { %166 = dma.vmem_to_hbm [thread:$0]  %s164_s5, 16, %s334_s2, [#allocation5]  }
 0x3cb   :  { %267 = dma.done.wait [#allocation5], 16  }
 0x3cc   :  { %268 = vsyncadd [#allocation5], 4294967280 }
 0x3cd   :  { %170 = vsyncpa [#allocation4], 1 }
 0x3ce   :  { %171 = vsyncpa [#allocation7], 1 }
 0x3cf   :  { %172 = vsyncpa [#allocation5], 1 }

</bundles_post_ra>
